<compile_context>
chip_gen: v7x
topology: tpu7x:2x2x1
jax: 0.10.0
libtpu: 0.0.40
codegen_flags: <defaults>
</compile_context>

<pallas_src>
import functools

import jax
import jax.numpy as jnp
from jax.experimental import pallas as pl
from jax.experimental.pallas import tpu as pltpu


_VMEM_LIMIT_BYTES = 48 * 1024 * 1024          # below v7x's 64 MiB physical VMEM
_VMEM_TILE_BUDGET = _VMEM_LIMIT_BYTES - 8 * 1024 * 1024   # headroom for Mosaic scratch


def _vae_kernel(x_ref, wcat_ref, bmu_ref, b1_ref, w2_ref, eps_ref, b2_ref,
                z_ref, mu_ref, lv_ref, *, d, mm_dtype):
    # x / eps arrive as f32 row tiles; cast for the MXU in-kernel (the VPU cast
    # hides under the matmul and avoids materializing a bf16 copy of x in HBM).
    x_mm = x_ref[...].astype(mm_dtype)

    # Fused shared-LHS matmul: one (TB, D) @ (D, 2D) dot instead of two DxD dots.
    fused = jnp.dot(x_mm, wcat_ref[...],
                    preferred_element_type=jnp.float32)                # (TB, 2D) f32

    mu = fused[:, :d] + bmu_ref[...]                                   # (TB, D)
    h = jax.nn.sigmoid(fused[:, d:] + b1_ref[...])                     # (TB, D)

    # Final Linear(D, 1): lane-reduce instead of a width-1 matmul; b2 is an
    # SMEM scalar.
    lv = jnp.sum(h * w2_ref[...], axis=-1, keepdims=True) + b2_ref[0]  # (TB, 1)

    # Reparameterize: logvar broadcast over D.
    z = mu + eps_ref[...] * jnp.exp(0.5 * lv)                          # (TB, D)

    mu_ref[...] = mu
    lv_ref[...] = lv
    z_ref[...] = z


def prepare_params(params, *, use_bf16_matmul=True):
    """One-time weight layout/dtype prep (call OUTSIDE the jitted hot path).

    Converts PyTorch (out, in) weights to a single pre-transposed, pre-cast
    (D, 2D) matrix  W_cat = [W_mu^T | W1^T]  plus f32 biases.
    """
    w_mu = jnp.asarray(params["w_mu"], jnp.float32)
    w1 = jnp.asarray(params["w1"], jnp.float32)
    d = w_mu.shape[0]
    mm_dtype = jnp.bfloat16 if use_bf16_matmul else jnp.float32
    w_cat = jnp.concatenate([w_mu.T, w1.T], axis=1).astype(mm_dtype)   # (D, 2D)
    return {
        "w_cat": w_cat,
        "b_mu": jnp.asarray(params["b_mu"], jnp.float32).reshape(1, d),
        "b1": jnp.asarray(params["b1"], jnp.float32).reshape(1, d),
        "w2": jnp.asarray(params["w2"], jnp.float32).reshape(1, d),
        "b2": jnp.asarray(params["b2"], jnp.float32).reshape(-1),      # (1,) SMEM scalar
    }


def _round_up(n, m):
    return ((n + m - 1) // m) * m


def _choose_batch_tile(batch, d, weight_bytes, weight_buffers):
    """Largest row tile (multiple of 8, <= 1024) whose pipeline buffers fit VMEM."""
    resident = weight_buffers * weight_bytes + 3 * d * 4 * 2     # weights + biases/W2
    per_row = 2 * (4 * d * 4 + 4)          # double-buffered x, eps, z, mu (+ logvar)
    for tb in (1024, 512, 256, 128, 64, 32, 16, 8):
        if resident + tb * per_row <= _VMEM_TILE_BUDGET:
            return min(tb, max(8, _round_up(batch, 8)))
    return 8


def vae_layer_forward(x, prepared, eps, *, batch_tile=None):
    """VAELayer forward in a single Pallas kernel.

    Args:
      x:        (B, D) float32 input.
      prepared: output of prepare_params(): w_cat (D, 2D), b_mu/b1/w2 (1, D),
                b2 (1,).
      eps:      (B, D) float32 standard-normal noise (torch.randn_like(mu)).
      batch_tile: rows per grid step (defaults to a VMEM-budgeted multiple of 8).

    Returns:
      (z, mu, logvar): (B, D), (B, D), (B, 1), all float32.
    """
    B, D = x.shape
    w_cat = prepared["w_cat"]
    assert w_cat.shape == (D, 2 * D), w_cat.shape
    mm_dtype = w_cat.dtype
    itemsize = jnp.dtype(mm_dtype).itemsize
    wcat_bytes = 2 * D * D * itemsize

    # The weight block is grid-invariant; when it is big enough to matter
    # (large D, v7x's 64 MiB VMEM) request single-buffering so the pipeline
    # does not hold two copies.  Small weights keep the default (2 buffers).
    if 2 * wcat_bytes > _VMEM_TILE_BUDGET // 4:
        wcat_spec = pl.BlockSpec((D, 2 * D), lambda i: (0, 0),
                                 pipeline_mode=pl.Buffered(1))
        weight_buffers = 1
    else:
        wcat_spec = pl.BlockSpec((D, 2 * D), lambda i: (0, 0))
        weight_buffers = 2

    tb = (_choose_batch_tile(B, D, wcat_bytes, weight_buffers)
          if batch_tile is None else batch_tile)
    grid = (pl.cdiv(B, tb),)                 # final partial block padded by Pallas

    row_spec = pl.BlockSpec((tb, D), lambda i: (i, 0))          # tiled over batch
    vec_spec = lambda: pl.BlockSpec((1, D), lambda i: (0, 0))   # VMEM-resident

    # NOTE: if production D is far from a multiple of 128, Mosaic pads vregs to
    # (8,128) internally; zero-padding D in HBM would not reduce that waste.
    in_specs = [
        row_spec,                                    # x (f32; cast in-kernel)
        wcat_spec,                                   # [W_mu^T | W1^T]
        vec_spec(),                                  # b_mu
        vec_spec(),                                  # b1
        vec_spec(),                                  # w2
        row_spec,                                    # eps
        pl.BlockSpec(memory_space=pltpu.SMEM),       # b2 scalar
    ]
    out_specs = (
        row_spec,                                    # z
        row_spec,                                    # mu
        pl.BlockSpec((tb, 1), lambda i: (i, 0)),     # logvar
    )
    out_shapes = (
        jax.ShapeDtypeStruct((B, D), jnp.float32),
        jax.ShapeDtypeStruct((B, D), jnp.float32),
        jax.ShapeDtypeStruct((B, 1), jnp.float32),
    )

    cost = pl.CostEstimate(
        flops=4 * B * D * D + 10 * B * D,            # fused matmul + elementwise
        transcendentals=B * D + B,                   # sigmoid + exp
        bytes_accessed=(2 * B * D * 4                # x, eps (f32 in HBM)
                        + 2 * D * D * itemsize       # fused weight (read once)
                        + 4 * D * 4 + 4              # biases, w2, b2
                        + 2 * B * D * 4 + B * 4),    # z, mu, logvar out
    )

    kernel = functools.partial(_vae_kernel, d=D, mm_dtype=mm_dtype)
    return pl.pallas_call(
        kernel,
        out_shape=out_shapes,
        grid=grid,
        in_specs=in_specs,
        out_specs=out_specs,
        compiler_params=pltpu.CompilerParams(
            dimension_semantics=("parallel",),       # batch shards across TCs (v7x)
            vmem_limit_bytes=_VMEM_LIMIT_BYTES,
        ),
        cost_estimate=cost,
    )(x, w_cat, prepared["b_mu"], prepared["b1"], prepared["w2"], eps,
      prepared["b2"])


def init_params(key, data_dim):
    """Deterministic parameter init mirroring the PyTorch module's __init__."""
    k_bmu, k_w1, k_b1, k_w2 = jax.random.split(key, 4)
    bound = 1.0 / jnp.sqrt(jnp.float32(data_dim))

    # VariationalMean: weight set to identity; bias keeps default Linear init.
    w_mu = jnp.eye(data_dim, dtype=jnp.float32)
    b_mu = jax.random.uniform(k_bmu, (1, data_dim), jnp.float32, -bound, bound)

    # VariationalVar: linear1 weight ~ N(0, 1/sqrt(D)) (init_custom), default
    # bias; linear2 weight ~ N(0, 1/sqrt(D)), bias constant -2.
    w1 = bound * jax.random.normal(k_w1, (data_dim, data_dim), jnp.float32)
    b1 = jax.random.uniform(k_b1, (1, data_dim), jnp.float32, -bound, bound)
    w2 = bound * jax.random.normal(k_w2, (1, data_dim), jnp.float32)
    b2 = jnp.full((1, 1), -2.0, dtype=jnp.float32)

    return {"w_mu": w_mu, "b_mu": b_mu, "w1": w1, "b1": b1, "w2": w2, "b2": b2}


def _reference_forward(x, params, eps):
    """Pure-JAX f32 reference for correctness checking."""
    mu = x @ params["w_mu"].T + params["b_mu"]
    h = jax.nn.sigmoid(x @ params["w1"].T + params["b1"])
    lv = h @ params["w2"].T + params["b2"]
    z = mu + eps * jnp.exp(0.5 * lv)
    return z, mu, lv


if __name__ == "__main__":
    # Small demo shapes; B=20 is deliberately NOT a multiple of the batch tile
    # so the padded final block path is exercised.
    B, D = 20, 32

    key = jax.random.PRNGKey(0)
    k_x, k_eps, k_p = jax.random.split(key, 3)
    x = jax.random.normal(k_x, (B, D), jnp.float32)
    eps = jax.random.normal(k_eps, (B, D), jnp.float32)   # torch.randn_like(mu)
    params = init_params(k_p, D)

    z_ref, mu_ref, lv_ref = _reference_forward(x, params, eps)

    # --- f32 MXU path: bit-faithful to the f32 reference. ---
    prep_f32 = prepare_params(params, use_bf16_matmul=False)
    fwd_f32 = jax.jit(functools.partial(vae_layer_forward, batch_tile=8))
    z, mu, lv = fwd_f32(x, prep_f32, eps)
    jax.block_until_ready((z, mu, lv))
    assert z.shape == (B, D) and mu.shape == (B, D) and lv.shape == (B, 1)
    assert jnp.allclose(z, z_ref, atol=1e-5, rtol=1e-5)
    assert jnp.allclose(mu, mu_ref, atol=1e-5, rtol=1e-5)
    assert jnp.allclose(lv, lv_ref, atol=1e-5, rtol=1e-5)

    # --- default bf16-MXU path (f32 accumulate / f32 elementwise). W_mu == I
    # at init, so mu inherits x's bf16 rounding -> looser tolerance here. ---
    prep_bf16 = prepare_params(params)                 # use_bf16_matmul=True
    fwd_bf16 = jax.jit(vae_layer_forward)              # auto batch tile
    z16, mu16, lv16 = fwd_bf16(x, prep_bf16, eps)
    jax.block_until_ready((z16, mu16, lv16))
    assert jnp.allclose(z16, z_ref, atol=5e-2, rtol=5e-2)
    assert jnp.allclose(mu16, mu_ref, atol=5e-2, rtol=5e-2)
    assert jnp.allclose(lv16, lv_ref, atol=5e-2, rtol=5e-2)

    print("KERNEL_OK")
</pallas_src>

<mosaic_0001>
module attributes {stable_mosaic.version = 11 : i64} {
  func.func @_vae_kernel(%arg0: i32, %arg1: memref<8x32xf32, #tpu.memory_space<vmem>>, %arg2: memref<32x64xf32, #tpu.memory_space<vmem>>, %arg3: memref<1x32xf32, #tpu.memory_space<vmem>>, %arg4: memref<1x32xf32, #tpu.memory_space<vmem>>, %arg5: memref<1x32xf32, #tpu.memory_space<vmem>>, %arg6: memref<8x32xf32, #tpu.memory_space<vmem>>, %arg7: memref<1xf32, #tpu.memory_space<smem>>, %arg8: memref<8x32xf32, #tpu.memory_space<vmem>>, %arg9: memref<8x32xf32, #tpu.memory_space<vmem>>, %arg10: memref<8x1xf32, #tpu.memory_space<vmem>>) attributes {dimension_semantics = [#tpu.dimension_semantics<parallel>], iteration_bounds = array<i64: 3>, scalar_prefetch = 0 : i64, scratch_operands = 0 : i64, tpu.core_type = #tpu.core_type<tc>, window_params = [{transform_indices = @transform_0, window_bounds = array<i64: 8, 32>}, {pipeline_mode = #tpu.pipeline_mode<synchronous>, transform_indices = @transform_1, window_bounds = array<i64: 32, 64>}, {pipeline_mode = #tpu.pipeline_mode<synchronous>, transform_indices = @transform_2, window_bounds = array<i64: 1, 32>}, {pipeline_mode = #tpu.pipeline_mode<synchronous>, transform_indices = @transform_3, window_bounds = array<i64: 1, 32>}, {pipeline_mode = #tpu.pipeline_mode<synchronous>, transform_indices = @transform_4, window_bounds = array<i64: 1, 32>}, {transform_indices = @transform_5, window_bounds = array<i64: 8, 32>}, {transform_indices = @transform_6, window_bounds = array<i64: 1>}, {transform_indices = @transform_7, window_bounds = array<i64: 8, 32>}, {transform_indices = @transform_8, window_bounds = array<i64: 8, 32>}, {transform_indices = @transform_9, window_bounds = array<i64: 8, 1>}]} {
    %c0 = arith.constant 0 : index
    %c0_0 = arith.constant 0 : index
    %0 = vector.load %arg1[%c0, %c0_0] : memref<8x32xf32, #tpu.memory_space<vmem>>, vector<8x32xf32>
    %c0_1 = arith.constant 0 : index
    %c0_2 = arith.constant 0 : index
    %1 = vector.load %arg2[%c0_1, %c0_2] : memref<32x64xf32, #tpu.memory_space<vmem>>, vector<32x64xf32>
    %cst = arith.constant dense<0.000000e+00> : vector<8x64xf32>
    %2 = tpu.matmul %0, %1, %cst {dimension_numbers = #tpu.dot_dimension_numbers<[1], [0], [0], [1], [0, 0, 1, 1], [], []>} : vector<8x32xf32>, vector<32x64xf32>, vector<8x64xf32> -> vector<8x64xf32>
    %3 = vector.extract_strided_slice %2 {offsets = [0, 0], sizes = [8, 32], strides = [1, 1]} : vector<8x64xf32> to vector<8x32xf32>
    %c0_3 = arith.constant 0 : index
    %c0_4 = arith.constant 0 : index
    %4 = vector.load %arg3[%c0_3, %c0_4] : memref<1x32xf32, #tpu.memory_space<vmem>>, vector<1x32xf32>
    %5 = vector.broadcast %4 : vector<1x32xf32> to vector<8x32xf32>
    %6 = arith.addf %3, %5 : vector<8x32xf32>
    %7 = vector.extract_strided_slice %2 {offsets = [0, 32], sizes = [8, 32], strides = [1, 1]} : vector<8x64xf32> to vector<8x32xf32>
    %c0_5 = arith.constant 0 : index
    %c0_6 = arith.constant 0 : index
    %8 = vector.load %arg4[%c0_5, %c0_6] : memref<1x32xf32, #tpu.memory_space<vmem>>, vector<1x32xf32>
    %9 = vector.broadcast %8 : vector<1x32xf32> to vector<8x32xf32>
    %10 = arith.addf %7, %9 : vector<8x32xf32>
    %11 = arith.negf %10 : vector<8x32xf32>
    %12 = math.exp %11 : vector<8x32xf32>
    %cst_7 = arith.constant 1.000000e+00 : f32
    %13 = vector.broadcast %cst_7 : f32 to vector<8x32xf32>
    %14 = arith.addf %13, %12 : vector<8x32xf32>
    %15 = arith.divf %13, %14 : vector<8x32xf32>
    %c0_8 = arith.constant 0 : index
    %c0_9 = arith.constant 0 : index
    %16 = vector.load %arg5[%c0_8, %c0_9] : memref<1x32xf32, #tpu.memory_space<vmem>>, vector<1x32xf32>
    %17 = vector.broadcast %16 : vector<1x32xf32> to vector<8x32xf32>
    %18 = arith.mulf %15, %17 : vector<8x32xf32>
    %cst_10 = arith.constant dense<0.000000e+00> : vector<8xf32>
    %19 = vector.multi_reduction <add>, %18, %cst_10 [1] : vector<8x32xf32> to vector<8xf32>
    %20 = vector.shape_cast %19 : vector<8xf32> to vector<8x1xf32>
    %c0_11 = arith.constant 0 : index
    %21 = memref.load %arg7[%c0_11] : memref<1xf32, #tpu.memory_space<smem>>
    %22 = vector.broadcast %21 : f32 to vector<8x1xf32>
    %23 = arith.addf %20, %22 : vector<8x1xf32>
    %c0_12 = arith.constant 0 : index
    %c0_13 = arith.constant 0 : index
    %24 = vector.load %arg6[%c0_12, %c0_13] : memref<8x32xf32, #tpu.memory_space<vmem>>, vector<8x32xf32>
    %cst_14 = arith.constant 5.000000e-01 : f32
    %25 = vector.broadcast %cst_14 : f32 to vector<8x1xf32>
    %26 = arith.mulf %25, %23 : vector<8x1xf32>
    %27 = math.exp %26 : vector<8x1xf32>
    %28 = vector.broadcast %27 : vector<8x1xf32> to vector<8x32xf32>
    %29 = arith.mulf %24, %28 : vector<8x32xf32>
    %30 = arith.addf %6, %29 : vector<8x32xf32>
    %c0_15 = arith.constant 0 : index
    %c0_16 = arith.constant 0 : index
    %31 = vector.load %arg9[%c0_15, %c0_16] : memref<8x32xf32, #tpu.memory_space<vmem>>, vector<8x32xf32>
    tpu.vector_store %arg9[%c0_15, %c0_16], %6 {strides = array<i32>} : memref<8x32xf32, #tpu.memory_space<vmem>>, vector<8x32xf32>,
    %c0_17 = arith.constant 0 : index
    %c0_18 = arith.constant 0 : index
    %32 = vector.load %arg10[%c0_17, %c0_18] : memref<8x1xf32, #tpu.memory_space<vmem>>, vector<8x1xf32>
    tpu.vector_store %arg10[%c0_17, %c0_18], %23 {strides = array<i32>} : memref<8x1xf32, #tpu.memory_space<vmem>>, vector<8x1xf32>,
    %c0_19 = arith.constant 0 : index
    %c0_20 = arith.constant 0 : index
    %33 = vector.load %arg8[%c0_19, %c0_20] : memref<8x32xf32, #tpu.memory_space<vmem>>, vector<8x32xf32>
    tpu.vector_store %arg8[%c0_19, %c0_20], %30 {strides = array<i32>} : memref<8x32xf32, #tpu.memory_space<vmem>>, vector<8x32xf32>,
    return
  }
  func.func @transform_0(%arg0: i32) -> (i32, i32) {
    %c0_i32 = arith.constant 0 : i32
    %c0_i32_0 = arith.constant 0 : i32
    return %arg0, %c0_i32 : i32, i32
  }
  func.func @transform_1(%arg0: i32) -> (i32, i32) {
    %c0_i32 = arith.constant 0 : i32
    %c0_i32_0 = arith.constant 0 : i32
    %c0_i32_1 = arith.constant 0 : i32
    return %c0_i32, %c0_i32_0 : i32, i32
  }
  func.func @transform_2(%arg0: i32) -> (i32, i32) {
    %c0_i32 = arith.constant 0 : i32
    %c0_i32_0 = arith.constant 0 : i32
    %c0_i32_1 = arith.constant 0 : i32
    return %c0_i32, %c0_i32_0 : i32, i32
  }
  func.func @transform_3(%arg0: i32) -> (i32, i32) {
    %c0_i32 = arith.constant 0 : i32
    %c0_i32_0 = arith.constant 0 : i32
    %c0_i32_1 = arith.constant 0 : i32
    return %c0_i32, %c0_i32_0 : i32, i32
  }
  func.func @transform_4(%arg0: i32) -> (i32, i32) {
    %c0_i32 = arith.constant 0 : i32
    %c0_i32_0 = arith.constant 0 : i32
    %c0_i32_1 = arith.constant 0 : i32
    return %c0_i32, %c0_i32_0 : i32, i32
  }
  func.func @transform_5(%arg0: i32) -> (i32, i32) {
    %c0_i32 = arith.constant 0 : i32
    %c0_i32_0 = arith.constant 0 : i32
    return %arg0, %c0_i32 : i32, i32
  }
  func.func @transform_6(%arg0: i32) -> i32 {
    %c0_i32 = arith.constant 0 : i32
    %c0_i32_0 = arith.constant 0 : i32
    return %c0_i32 : i32
  }
  func.func @transform_7(%arg0: i32) -> (i32, i32) {
    %c0_i32 = arith.constant 0 : i32
    %c0_i32_0 = arith.constant 0 : i32
    return %arg0, %c0_i32 : i32, i32
  }
  func.func @transform_8(%arg0: i32) -> (i32, i32) {
    %c0_i32 = arith.constant 0 : i32
    %c0_i32_0 = arith.constant 0 : i32
    return %arg0, %c0_i32 : i32, i32
  }
  func.func @transform_9(%arg0: i32) -> (i32, i32) {
    %c0_i32 = arith.constant 0 : i32
    %c0_i32_0 = arith.constant 0 : i32
    return %arg0, %c0_i32 : i32, i32
  }
}

</mosaic_0001>

<bundles_post_ra>
// kernel: vae_layer_forward.1
= control target key start
LH: loop header
LB: loop body
LE: loop exit
PB: predicated region body
PF: predicated region fallthrough
CT: control target
= control target key end

     0   :  { %s1432_s0 = inlined_call_operand.hbm [shape: f32[20,32], index: 0, kind: input, shape index: {}]   ;;  %s1433_s1 = inlined_call_operand.hbm [shape: f32[32,64], index: 1, kind: input, shape index: {}]   ;;  %s1434_s2 = inlined_call_operand.vmem [shape: f32[1,32], index: 2, kind: input, shape index: {}]   ;;  %s1435_s3 = inlined_call_operand.vmem [shape: f32[1,32], index: 3, kind: input, shape index: {}]   ;;  %s1436_s4 = inlined_call_operand.vmem [shape: f32[1,32], index: 4, kind: input, shape index: {}]   ;;  %s1437_s5 = inlined_call_operand.hbm [shape: f32[20,32], index: 5, kind: input, shape index: {}]   ;;  %s1438_s6 = inlined_call_operand.<no memory space> [shape: f32[1], index: 6, kind: input, shape index: {}]   ;;  %s1439_s7 = inlined_call_operand.hbm [shape: f32[20,32], index: 7, kind: output, shape index: {0}]   ;;  %s1440_s8 = inlined_call_operand.hbm [shape: f32[20,32], index: 8, kind: output, shape index: {1}]   ;;  %s1441_s9 = inlined_call_operand.vmem [shape: f32[20,1], index: 9, kind: output, shape index: {2}]  }
   0x1   :  { %1448 = sst [smem:[#allocation19_spill]] %s1432_s0 }
   0x2   :  { %1449 = sst [smem:[#allocation20_spill]] %s1437_s5 }
   0x3   :  { %15 = sst [smem:[#allocation2]] %s1438_s6 }
   0x4   :  { %16 = vsyncpa [#allocation4], 0 }
   0x5   :  { %18 = vsyncpa [#allocation4 + $0x1], 0 }
   0x6   :  { %19 = vsyncpa [#allocation7], 0 }
   0x7   :  { %20 = vsyncpa [#allocation5], 0 }
   0x8   :  { %22 = vsyncpa [#allocation5 + $0x1], 0 }
   0x9   :  { %23 = vsyncpa [#allocation11], 0 }
   0xa   :  { %25 = vsyncpa [#allocation11 + $0x1], 0  ;;  %s1136_s11 = smov 0   ;;  %s1138_s12 = smov 0  }
   0xb   :  { %s1140_s13 = smov 0   ;;  %s1142_s14 = smov 0  }
   0xc LB: > { %1450 = sst [smem:[#allocation17_spill]] %s1065_s13  ;;  %s1157_s6 = sadd.s32 1, %s1069_s14   ;;  %s1069_s14 = sphi %s1142_s14, %s1471_s14   ;;  %s1065_s13 = sphi %s1140_s13, %s1468_s13   ;;  %s1061_s12 = sphi %s1138_s12, %s1470_s12   ;;  %s1057_s11 = sphi %s1136_s11, %s1469_s11  }
   0xd   : > { %s38_s15 = sadd.s32 1, %s1065_s13  ;;  %s35_s16 = ssub.s32 %s1069_s14, %s1157_s6 }
   0xe   : > { %p45_p0 = scmp.ne.s32.totalorder %s1065_s13, %s1061_s12  ;;  %p36_p1 = scmp.eq.s32.totalorder %s35_s16, 0 }
   0xf   : > { %p46_p2 = scmp.eq.s32.totalorder %s1069_s14, 0  ;;  %p826_p3 = scmp.lt.s32.totalorder %s1069_s14, 3 }
  0x10   : > { %s1167_s17 = scalar_select %p36_p1, %s1065_s13, %s38_s15  }
  0x11   : > { %p47_p4 = por %p46_p2, %p45_p0  ;;  %s309_s18 = sand.u32 1, %s1069_s14  }
  0x12   : > { %1451 = sst [smem:[#allocation18_spill]] %s1167_s17  ;;  %s311_s19 = sand.u32 1, %s1065_s13  }
  0x13   : > { %s1174_s20 = sshll.u32 %s311_s19, 3  ;;  %s752_s21 = sshll.u32 %s1069_s14, 7 }
  0x14   : > { %s1452_s0 = sld [smem:[#allocation19_spill]]  ;;  %s313_s25 = scalar_lea.vmem [#allocation3], %s1174_s20 }
  0x15   : > { %s320_s26 = sshll.u32 %s313_s25, 4  ;;  %p1185_p5 = pnand %p826_p3, %p47_p4  ;;  %s1189_s26 = int_to_ptr.vmem [resolvable:$true] %s320_s26 }
  0x16   : > { %s1191_s28 = scalar_lea.sflag [#allocation4], %s309_s18 }
  0x17   : > { %p877_p7 = pneg %p1185_p5 }
  0x1a   : > { %s1182_s24 = scalar_lea.hbm %s1452_s0, %s752_s21  ;;  %s880_s15 = scalar_lea.hbm %s1452_s0, 384 }
  0x1b   : > { %s875_s29 = scalar_lea.hbm %s1182_s24, 128  ;;  %p881_p10 = scmp.lt.u32.totalorder %s1182_s24, %s1452_s0 }
  0x1c   : > { %p876_p6 = scmp.ne.s32.totalorder %s1182_s24, %s875_s29  ;;  %p882_p11 = scmp.lt.u32.totalorder %s880_s15, %s875_s29 }
  0x1d   : > { %p884_p13 = scmp.lt.u32.totalorder %s875_s29, %s1182_s24 }
  0x1e   : > { %p878_p8 = pnand %p877_p7, %p876_p6  ;;  %p883_p12 = por %p882_p11, %p881_p10 }
  0x20   : > { %p879_p9 = pneg %p878_p8  ;;  %p885_p1 = por %p884_p13, %p883_p12 }
  0x22   : > { %p886_p2 = pnand %p885_p1, %p879_p9 }
  0x24   : > { %889 = shalt.err (!%p886_p2)
}
  0x25   : > { %s890_s18 = scalar_lea.vmem %s1189_s26, 128  ;;  %s1071_s22 = smov [#allocation3]  }
  0x26   : > { %p891_p3 = scmp.ne.s32.totalorder %s1189_s26, %s890_s18  ;;  %s895_s23 = sshll.u32 %s1071_s22, 4  ;;  %s896_s23 = int_to_ptr.vmem [resolvable:$false] %s895_s23 }
  0x27   : > { %s897_s25 = scalar_lea.vmem %s896_s23, 256  ;;  %p898_p8 = scmp.lt.s32.totalorder %s1189_s26, %s896_s23 }
  0x28   : > { %p893_p4 = pnand %p891_p3, %p877_p7  ;;  %p899_p10 = scmp.lt.s32.totalorder %s897_s25, %s890_s18 }
  0x2a   : > { %p894_p6 = pneg %p893_p4  ;;  %p900_p11 = por %p899_p10, %p898_p8 }
  0x2c   : > { %p901_p12 = pnand %p900_p11, %p894_p6 }
  0x2e   : > { %904 = shalt.err (!%p901_p12)
}
  0x2f   : > { %814 = dma.hbm_to_vmem [thread:$0]  (!%p1185_p5), %s1182_s24, 128, %s1189_s26, %s1191_s28  }
  0x30   : > { %s1220_s29 = sadd.s32 4294967295, %s1069_s14   ;;  %s747_s30 = sadd.s32 4294967294, %s1069_s14  }
  0x31   : > { %p51_p9 = scmp.ne.s32.totalorder %s1061_s12, %s1057_s11  ;;  %p1442_p13 = scmp.eq.s32.totalorder %s1220_s29, 0 }
  0x32   : > { %p206_p1 = scmp.eq.s32.totalorder %s1220_s29, 2  ;;  %p212_p2 = scmp.eq.s32.totalorder %s747_s30, 2 }
  0x33   : > { %p1229_p3 = por %p1442_p13, %p51_p9  ;;  %p748_p4 = scmp.ge.s32.totalorder %s1069_s14, 1 }
  0x34   : > { %p1237_p6 = por %p206_p1, %p45_p0  ;;  %p1241_p8 = por %p212_p2, %p51_p9 }
  0x35   : > { %s1454_s10 = scalar_select %p1229_p3, 1, 0 }
  0x36   : > { %s1455_s24 = scalar_select %p1237_p6, 1, 0 }
  0x37   : > { %s1456_s26 = scalar_select %p1241_p8, 1, 0 }
  0x38   : > { %p271_p10 = scmp.lt.s32.totalorder %s1069_s14, 4  ;;  %s1072_s16 = smov [#allocation6]  }
  0x39   : > { %s283_s19 = sshll.u32 %s1072_s16, 4  ;;  %s1458_s5 = sld [smem:[#allocation20_spill]]  ;;  %s1260_s19 = int_to_ptr.vmem [resolvable:$true] %s283_s19 }
  0x3a   : > { %p1246_p11 = pnand %p748_p4, %p271_p10  ;;  %s331_s25 = scalar_lea.vmem [#allocation8], %s1174_s20 }
  0x3b   : > { %s338_s30 = sshll.u32 %s331_s25, 4  ;;  %s339_s30 = int_to_ptr.vmem [resolvable:$true] %s338_s30 }
  0x3c   : > { %s1457_s15 = scalar_select %p1246_p11, 1, 0 }
  0x3d   : > { %p807_p0 = pneg %p1246_p11 }
  0x3f   : > { %s1255_s23 = scalar_lea.hbm %s1458_s5, %s752_s21  ;;  %p1264_p12 = pnand %p807_p0, %p1442_p13 }
  0x40   : > { %s905_s0 = scalar_lea.hbm %s1255_s23, 128  ;;  %s910_s22 = scalar_lea.hbm %s1458_s5, 384 }
  0x41   : > { %s1459_s16 = scalar_select %p1264_p12, 1, 0 }
  0x42   : > { %p906_p9 = scmp.ne.s32.totalorder %s1255_s23, %s905_s0  ;;  %p911_p4 = scmp.lt.u32.totalorder %s1255_s23, %s1458_s5 }
  0x43   : > { %p912_p10 = scmp.lt.u32.totalorder %s910_s22, %s905_s0  ;;  %p914_p0 = scmp.lt.u32.totalorder %s905_s0, %s1255_s23 }
  0x44   : > { %p908_p1 = pnand %p906_p9, %p877_p7 }
  0x45   : > { %p913_p8 = por %p912_p10, %p911_p4 }
  0x46   : > { %p909_p2 = pneg %p908_p1 }
  0x47   : > { %p915_p13 = por %p914_p0, %p913_p8 }
  0x49   : > { %p916_p6 = pnand %p915_p13, %p909_p2 }
  0x4b   : > { %919 = shalt.err (!%p916_p6)
}
  0x4c   : > { %s920_s17 = scalar_lea.vmem %s339_s30, 128  ;;  %s1073_s13 = smov [#allocation8]  }
  0x4d   : > { %p921_p3 = scmp.ne.s32.totalorder %s339_s30, %s920_s17  ;;  %s925_s21 = sshll.u32 %s1073_s13, 4  ;;  %s926_s21 = int_to_ptr.vmem [resolvable:$false] %s925_s21 }
  0x4e   : > { %s927_s18 = scalar_lea.vmem %s926_s21, 256  ;;  %p928_p11 = scmp.lt.s32.totalorder %s339_s30, %s926_s21 }
  0x4f   : > { %p923_p9 = pnand %p921_p3, %p877_p7  ;;  %p929_p12 = scmp.lt.s32.totalorder %s927_s18, %s920_s17 }
  0x51   : > { %p924_p1 = pneg %p923_p9  ;;  %p930_p4 = por %p929_p12, %p928_p11 }
  0x53   : > { %p931_p10 = pnand %p930_p4, %p924_p1 }
  0x55   : > { %934 = shalt.err (!%p931_p10)
}
  0x56   : > { %817 = dma.hbm_to_vmem [thread:$0]  (!%p1185_p5), %s1255_s23, 128, %s339_s30, %s1191_s28  }
  0x57   : > { %s935_s20 = scalar_lea.hbm %s1433_s1, 512  ;;  %p1460_p13 = scmp.ne.s32.totalorder %s1459_s16, 0 }
  0x58   : > { %p936_p7 = scmp.ne.s32.totalorder %s1433_s1, %s935_s20  ;;  %p942_p11 = scmp.lt.u32.totalorder %s935_s20, %s1433_s1 }
  0x59   : > { %p937_p3 = pneg %p1460_p13 }
  0x5b   : > { %p938_p6 = pnand %p937_p3, %p936_p7 }
  0x5d   : > { %p939_p8 = pneg %p938_p6 }
  0x5f   : > { %p944_p12 = pnand %p942_p11, %p939_p8 }
  0x61   : > { %947 = shalt.err (!%p944_p12)
}
  0x62   : > { %s948_s27 = scalar_lea.vmem %s1260_s19, 512  ;;  %p956_p9 = scmp.lt.s32.totalorder %s1260_s19, %s1260_s19 }
  0x63   : > { %p949_p5 = scmp.ne.s32.totalorder %s1260_s19, %s948_s27  ;;  %p957_p1 = scmp.lt.s32.totalorder %s948_s27, %s948_s27 }
  0x65   : > { %p951_p2 = pnand %p949_p5, %p937_p3  ;;  %p958_p4 = por %p957_p1, %p956_p9 }
  0x67   : > { %p952_p0 = pneg %p951_p2 }
  0x69   : > { %p959_p10 = pnand %p958_p4, %p952_p0 }
  0x6b   : > { %962 = shalt.err (!%p959_p10)
}
  0x6c   : > { %s1074_s5 = smov 128   ;;  %s1075_s28 = smov 8  }
  0x6d   : > { %810 = dma.hbm_to_vmem [thread:$0]  (!%p1460_p13), %s1433_s1, 512, %s1260_s19, [#allocation7], %s1074_s5, %s1074_s5, %s1075_s28  }
  0x6e   : > { %p1461_p7 = scmp.ne.s32.totalorder %s1457_s15, 0 }
  0x6f   : > { %s349_s21 = sand.u32 (!%p1461_p7), 1, %s1220_s29   ;;  %s1313_s18 = sand.u32 (!%p1461_p7), 1, %s1061_s12  }
  0x70   : > { %347 = sbr.rel (%p1461_p7) target bundleno = 671 (0x29f), region = 48  ;;  %s1316_s0 = sshll.u32 (!%p1461_p7), %s1313_s18, 3 }
  0x71   : > { %s350_s22 = scalar_lea.sflag (!%p1461_p7), [#allocation4], %s349_s21  ;;  %s353_s20 = scalar_lea.vmem (!%p1461_p7), [#allocation3], %s1316_s0 }
  0x72   : > { %p1462_p3 = scmp.ne.s32.totalorder (!%p1461_p7), %s1454_s10, 0 }
  0x77   : > { %1036 = dma.done.wait (%p1462_p3), %s350_s22, 128  }
  0x78   : > { %1038 = vsyncadd (%p1462_p3), %s350_s22, 4294967168  ;;  %p1463_p13 = scmp.eq.s32.totalorder %s1220_s29, 0 }
  0x7a   : > { %1040 = dma.done.wait (%p1463_p13), [#allocation7], 512   ;;  %p1464_p6 = pmov %p1463_p13 }
  0x7b   : > { %s366_s15 = scalar_lea.vmem [#allocation8], %s1316_s0 }
  0x7c   : > { %1042 = vsyncadd (%p1464_p6), [#allocation7], 4294966784 }
  0x7d   : > { %1044 = dma.done.wait (%p1462_p3), %s350_s22, 128  }
  0x7e   : > { %1046 = vsyncadd (%p1462_p3), %s350_s22, 4294967168  ;;  %v1076_v0 = vmov 0.0|0.0   ;;  %vm1077_vm0 = vmmov 0   ;;  %v1078_v1 = vmov 0.0   ;;  %v420_v2 = vld [vmem:[#allocation6] sm:$0xff]  ;;  %v421_v3 = vld [vmem:[#allocation6 + $0x8] sm:$0xff] }
  0x7f   : > { %789 = vmatprep.subr.bf16.mxu0 %v1076_v0  ;;  %786 = vmatprep.mubr.msk.f32.mxu0 %vm1077_vm0, %v1078_v1  ;;  %v422_v4 = vld [vmem:[#allocation6 + $0x10] sm:$0xff]  ;;  %v790_v5 = vpack.c.bf16 %v421_v3, %v420_v2  ;;  %v423_v6 = vld [vmem:[#allocation6 + $0x18] sm:$0xff]  ;;  %s1079_s25 = smov 32   ;;  %vm424_vm1 = vcmask 261120   ;;  %s408_s5 = scalar_lea.vmem [#allocation10], %s1316_s0 }
  0x80   : > { %v764_v7 = vld [vmem:[%s1435_s3] ss:$0 sm:$0xff]  ;;  %v793_v8 = vpack.c.bf16 %v423_v6, %v422_v4  ;;  %s1080_s28 = smov 96   ;;  %s769_s23 = sshll.u32 %s1220_s29, 7 }
  0x81   : > { %512 = vrot.lane.b32.xlu0 %v764_v7, %s1079_s25  ;;  %791 = vmatpush3.bf16.msra.mxu0 %v790_v5  ;;  %v766_v9 = vld [vmem:[%s1436_s4] ss:$0 sm:$0xff]  ;;  %s1354_s22 = scalar_lea.hbm %s1440_s8, %s769_s23  ;;  %s558_s19 = scalar_lea.sflag [#allocation11], %s1313_s18 }
  0x82   : > { %792 = vmatprep.subr.bf16.mxu0 %v1076_v0  ;;  %v419_v10 = vld [vmem:[%s353_s20] sm:$0xff]  ;;  %s588_s20 = sshll.u32 %s408_s5, 4  ;;  %p1465_p11 = scmp.ne.s32.totalorder %s1455_s24, 0  ;;  %s589_s20 = int_to_ptr.vmem [resolvable:$true] %s588_s20 }
  0x83   : > { %v763_v12 = vld [vmem:[%s1434_s2] ss:$0 sm:$0xff]  ;;  %s963_s16 = scalar_lea.vmem %s589_s20, 128 }
  0x84   : > { %p964_p8 = scmp.ne.s32.totalorder %s589_s20, %s963_s16 }
  0x85   : > { %528 = vrot.lane.b32.xlu0 %v766_v9, %s1079_s25  ;;  %794 = vmatpush3.bf16.msra.mxu0 %v793_v8  ;;  %s1081_s25 = smov [#allocation10]  }
  0x86   : > { %p965_p12 = pnand %p964_p8, %p1465_p11  ;;  %s967_s10 = sshll.u32 %s1081_s25, 4  ;;  %s968_s10 = int_to_ptr.vmem [resolvable:$false] %s967_s10 }
  0x87   : > { %s969_s13 = scalar_lea.vmem %s968_s10, 256  ;;  %p970_p2 = scmp.lt.s32.totalorder %s589_s20, %s968_s10 }
  0x88   : > { %787 = vmatmul.mubr.msk.f32.vlgmr.msra.gmra.mrb[0].mxu0 %vm424_vm1, %v419_v10  ;;  %p966_p5 = pneg %p965_p12  ;;  %p971_p0 = scmp.lt.s32.totalorder %s969_s13, %s963_s16 }
  0x8a   : > { %p972_p9 = por %p971_p0, %p970_p2 }
  0x8c   : > { %p973_p1 = pnand %p972_p9, %p966_p5 }
  0xf3   : > { %v513_v11 = vpop.permute.xlu0 %512 }
  0xf7   : > { %v529_v20 = vpop.permute.xlu0 %528 }
 0x15b   : > { %v494_v13 = vpop.f32.mrb[0].mxu0 }
 0x15c   : > { %v1342_v14 = vadd.f32 %v763_v12, %v494_v13  ;;  %v515_v15 = vadd.f32 %v513_v11, %v494_v13  ;;  %v788_v16 = vpop.f32.mrb[1].mxu0 }
 0x15e   : > { %v765_v17 = vmul.f32 -1.442695, %v515_v15  ;;  %548 = vst.msk [vmem:[%s408_s5] sm:$0xff] %vm424_vm1, %v1342_v14 }
 0x160   : > { %869 = vpow2.f32 %v765_v17 }
 0x16a   : > { %v870_v18 = vpop.eup %869 }
 0x16b   : > { %v519_v19 = vadd.f32 1.0, %v870_v18 }
 0x16d   : > { %871 = vrcp.f32 %v519_v19 }
 0x177   : > { %v872_v21 = vpop.eup %871 }
 0x178   : > { %v531_v22 = vmul.f32 %v872_v21, %v529_v20 }
 0x17a   : > { %533 = vrot.lane.b32.xlu1 %v531_v22, %s1080_s28 }
 0x1ec   : > { %v534_v23 = vpop.permute.xlu1 %533 }
 0x1ed   : > { %v536_v24 = vsel %vm424_vm1, %v534_v23, 0.0 }
 0x1ee   : > { %537 = vadd.xlane.f32.xlu1 %v536_v24 }
 0x1ef   : > { %976 = shalt.err (!%p973_p1)
}
 0x1f0   : > { %s977_s17 = scalar_lea.hbm %s1354_s22, 128  ;;  %s981_s28 = scalar_lea.hbm %s1440_s8, 384 }
 0x1f1   : > { %p978_p4 = scmp.ne.s32.totalorder %s1354_s22, %s977_s17  ;;  %p982_p3 = scmp.lt.u32.totalorder %s1354_s22, %s1440_s8 }
 0x1f2   : > { %p983_p13 = scmp.lt.u32.totalorder %s981_s28, %s977_s17  ;;  %p985_p8 = scmp.lt.u32.totalorder %s977_s17, %s1354_s22 }
 0x1f3   : > { %p979_p10 = pnand %p978_p4, %p1465_p11 }
 0x1f4   : > { %p984_p6 = por %p983_p13, %p982_p3 }
 0x1f5   : > { %p980_p7 = pneg %p979_p10 }
 0x1f6   : > { %p986_p12 = por %p985_p8, %p984_p6 }
 0x1f8   : > { %p987_p5 = pnand %p986_p12, %p980_p7 }
 0x1fa   : > { %990 = shalt.err (!%p987_p5)
}
 0x1fb   : > { %804 = dma.vmem_to_hbm [thread:$0]  (%p1465_p11), %s589_s20, 128, %s1354_s22, %s558_s19   ;;  %vm549_vm2 = vcmask 7168   ;;  %v542_v30 = vld [vmem:[%s366_s15] sm:$0xff] }
 0x1fc   : > { %p415_p2 = scmp.lt.s32.totalorder %s1220_s29, 2  ;;  %s539_s16 = sld [smem:[#allocation2]] }
 0x1fd   : > { %s401_s22 = scalar_lea.vmem [#allocation9], %s1316_s0  ;;  %s1388_s28 = scalar_lea.hbm %s1439_s7, %s769_s23 }
 0x1fe   : > { %s416_s25 = scalar_select %p415_p2, %s1220_s29, 2 }
 0x1ff   : > { %s575_s20 = sshll.u32 %s401_s22, 4  ;;  %s553_s15 = scalar_lea.sflag [#allocation5], %s1313_s18  ;;  %s1390_s20 = int_to_ptr.vmem [resolvable:$true] %s575_s20 }
 0x200   : > { %s761_s10 = sshll.u32 %s416_s25, 3  ;;  %s991_s30 = scalar_lea.vmem %s1390_s20, 128 }
 0x201   : > { %s418_s17 = scalar_lea.vmem %s1441_s9, %s761_s10  ;;  %p992_p0 = scmp.ne.s32.totalorder %s1390_s20, %s991_s30 }
 0x202   : > { %v540_v25 = vstv %s539_s16  ;;  %s1082_s0 = smov [#allocation9]  }
 0x203   : > { %p993_p9 = pnand %p992_p0, %p1465_p11  ;;  %s995_s29 = sshll.u32 %s1082_s0, 4  ;;  %s996_s29 = int_to_ptr.vmem [resolvable:$false] %s995_s29 }
 0x204   : > { %s997_s21 = scalar_lea.vmem %s996_s29, 256  ;;  %p998_p4 = scmp.lt.s32.totalorder %s1390_s20, %s996_s29 }
 0x205   : > { %p994_p1 = pneg %p993_p9  ;;  %p999_p10 = scmp.lt.s32.totalorder %s997_s21, %s991_s30 }
 0x207   : > { %p1000_p7 = por %p999_p10, %p998_p4 }
 0x209   : > { %p1001_p3 = pnand %p1000_p7, %p994_p1 }
 0x27b   : > { %v538_v26 = vpop.xlane.xlu1 %537 }
 0x27c   : > { %v541_v27 = vadd.f32 %v540_v25, %v538_v26 }
 0x27e   : > { %v543_v28 = vmul.f32 0.5, %v541_v27  ;;  %550 = vst.msk [vmem:[%s418_s17] sm:$0xff] %vm549_vm2, %v541_v27 }
 0x280   : > { %v544_v29 = vmul.f32 1.442695, %v543_v28 }
 0x282   : > { %873 = vpow2.f32 %v544_v29 }
 0x28c   : > { %v874_v31 = vpop.eup %873 }
 0x28d   : > { %v546_v32 = vmul.f32 %v874_v31, %v542_v30 }
 0x28f   : > { %v547_v33 = vadd.f32 %v546_v32, %v1342_v14 }
 0x291   : > { %551 = vst.msk [vmem:[%s401_s22] sm:$0xff] %vm424_vm1, %v547_v33 }
 0x292   : > { %1004 = shalt.err (!%p1001_p3)
}
 0x293   : > { %s1005_s18 = scalar_lea.hbm %s1388_s28, 128  ;;  %s1009_s25 = scalar_lea.hbm %s1439_s7, 384 }
 0x294   : > { %p1006_p13 = scmp.ne.s32.totalorder %s1388_s28, %s1005_s18  ;;  %p1010_p12 = scmp.lt.u32.totalorder %s1388_s28, %s1439_s7 }
 0x295   : > { %p1011_p5 = scmp.lt.u32.totalorder %s1009_s25, %s1005_s18  ;;  %p1013_p0 = scmp.lt.u32.totalorder %s1005_s18, %s1388_s28 }
 0x296   : > { %p1007_p6 = pnand %p1006_p13, %p1465_p11 }
 0x297   : > { %p1012_p2 = por %p1011_p5, %p1010_p12 }
 0x298   : > { %p1008_p8 = pneg %p1007_p6 }
 0x299   : > { %p1014_p9 = por %p1013_p0, %p1012_p2 }
 0x29b   : > { %p1015_p1 = pnand %p1014_p9, %p1008_p8 }
 0x29d   : > { %1018 = shalt.err (!%p1015_p1)
}
 0x29e   : > { %803 = dma.vmem_to_hbm [thread:$0]  (%p1465_p11), %s1390_s20, 128, %s1388_s28, %s553_s15  }
 0x29f PF: > { %p828_p4 = scmp.ge.s32.totalorder %s1069_s14, 2  ;;  %s603_s27 = sand.u32 1, %s1057_s11  }
 0x2a0   : > { %p1466_p10 = scmp.ne.s32.totalorder %s1456_s26, 0  ;;  %s604_s17 = scalar_lea.sflag [#allocation5], %s603_s27 }
 0x2a2   : > { %p819_p7 = pnand %p828_p4, %p1466_p10 }
 0x2a4   : > { %1048 = dma.done.wait (!%p819_p7), %s604_s17, 128  }
 0x2a5   : > { %1050 = vsyncadd (!%p819_p7), %s604_s17, 4294967168  ;;  %s613_s22 = scalar_lea.sflag [#allocation11], %s603_s27 }
 0x2a6   : > { %1052 = dma.done.wait (!%p819_p7), %s613_s22, 128  }
 0x2a7   : > { %1054 = vsyncadd (!%p819_p7), %s613_s22, 4294967168  ;;  %s1467_s24 = sld [smem:[#allocation17_spill]]  ;;  %s1468_s13 = sld [smem:[#allocation18_spill]] }
 0x2a8   : > { %p28_p11 = scmp.ge.s32.totalorder %s1157_s6, 5   ;;  %s1469_s11 = smov %s1061_s12 }
 0x2a9   : > { %s1471_s14 = smov %s1157_s6 }
 0x2aa   :  { %30 = sbr.rel (!%p28_p11) target bundleno = 12 (0xc), region = 137 }
 0x2ad   : > { %s1470_s12 = smov %s1467_s24 }
 0x2b1   :  { %625 = vsyncpa [#allocation4], 1 }
 0x2b2   :  { %627 = vsyncpa [#allocation4 + $0x1], 1 }
 0x2b3   :  { %628 = vsyncpa [#allocation7], 1 }
 0x2b4   :  { %629 = vsyncpa [#allocation5], 1 }
 0x2b5   :  { %631 = vsyncpa [#allocation5 + $0x1], 1 }
 0x2b6   :  { %632 = vsyncpa [#allocation11], 1 }
 0x2b7   :  { %634 = vsyncpa [#allocation11 + $0x1], 1 }

</bundles_post_ra>
